<compile_context>
chip_gen: v6e
topology: v6e:2x2x1
jax: 0.10.0
libtpu: 0.0.40
codegen_flags: <defaults>
</compile_context>

<pallas_src>
from functools import partial

import jax
import jax.numpy as jnp
from jax.experimental import pallas as pl
from jax.experimental.pallas import tpu as pltpu


def _dqn_kernel(x_ref, w1_ref, b1_ref, w2_ref, b2_ref, out_ref):
    # x:  [TB, D]   (f32, cast to bf16 in-kernel)
    # w1: [D, H]    (bf16)    b1: [1, H]      (f32)
    # w2: [H, Apad] (bf16)    b2: [1, Apad]   (f32)
    # out:[TB, Apad](f32)
    x = x_ref[...].astype(w1_ref.dtype)                      # in-kernel bf16 cast
    h = jnp.dot(x, w1_ref[...], preferred_element_type=jnp.float32)
    h = jnp.maximum(h + b1_ref[...], 0.0)                    # bias + ReLU in f32
    a = jnp.dot(h.astype(w2_ref.dtype), w2_ref[...],
                preferred_element_type=jnp.float32)
    out_ref[...] = (a + b2_ref[...]).astype(out_ref.dtype)


def _round_up(x, m):
    return ((x + m - 1) // m) * m


def prepare_params(w1, b1, w2, b2, *, compute_dtype=jnp.bfloat16):
    """One-time parameter preparation (cast + lane padding).

    w1: [D, 256] (transposed PyTorch fc1.weight), b1: [256]
    w2: [256, A] (transposed PyTorch fc2.weight), b2: [A]
    Returns (params, n_actions); reuse `params` across every forward call.
    """
    D, H = w1.shape
    A = w2.shape[1]
    A_pad = _round_up(A, 128)                     # lane-dense output stores
    w1c = w1.astype(compute_dtype)
    w2c = jnp.pad(w2, ((0, 0), (0, A_pad - A))).astype(compute_dtype)
    b1c = b1.reshape(1, H).astype(jnp.float32)
    b2c = jnp.pad(b2.reshape(1, A), ((0, 0), (0, A_pad - A))).astype(jnp.float32)
    return (w1c, b1c, w2c, b2c), A


def _choose_tb(B, block_rows):
    """Batch tile: multiple of 16; collapse grid to few steps, but keep >= 2
    steps for larger batches so v7x megacore can shard the batch axis."""
    block_rows = max(16, _round_up(block_rows, 16))
    b16 = _round_up(B, 16)
    if b16 <= min(256, block_rows):
        return b16                                # single grid step
    n_steps = max(2, -(-b16 // block_rows))       # >= 2 steps (v7x: 2 TCs)
    return _round_up(-(-b16 // n_steps), 16)


@partial(jax.jit, static_argnames=("n_actions", "block_rows", "slice_output"))
def dqn_forward_prepared(state, params, n_actions, *, block_rows=2048,
                         slice_output=True):
    """Fused fc1 -> relu -> fc2 forward using pre-prepared params."""
    w1c, b1c, w2c, b2c = params
    B, D = state.shape
    H = w1c.shape[1]
    A_pad = w2c.shape[1]

    tb = _choose_tb(B, block_rows)
    B_pad = _round_up(B, tb)

    x = state if state.dtype == jnp.float32 else state.astype(jnp.float32)
    if B_pad != B:                                # skipped when already aligned
        x = jnp.pad(x, ((0, B_pad - B), (0, 0)))

    grid = (B_pad // tb,)

    # Only raise the scoped-VMEM limit if a very large tile needs it
    # (v5e default is ~16 MiB); at the default tile we stay well under.
    tile_bytes = tb * D * 4 + tb * A_pad * 4
    weight_bytes = (w1c.size * 2 + w2c.size * 2 + b1c.size * 4 + b2c.size * 4)
    vmem_est = 2 * tile_bytes + 2 * weight_bytes
    cp_kwargs = dict(dimension_semantics=("parallel",))
    if vmem_est > 12 * 1024 * 1024:
        cp_kwargs["vmem_limit_bytes"] = min(int(2 * vmem_est), 48 * 1024 * 1024)

    out = pl.pallas_call(
        _dqn_kernel,
        out_shape=jax.ShapeDtypeStruct((B_pad, A_pad), jnp.float32),
        grid_spec=pltpu.PrefetchScalarGridSpec(
            num_scalar_prefetch=0,
            grid=grid,
            in_specs=[
                # batch-varying activation tile (f32, cast in-kernel)
                pl.BlockSpec((tb, D), lambda i: (i, 0)),
                # weights / biases: same block every step -> VMEM-resident
                pl.BlockSpec((D, H), lambda i: (0, 0)),
                pl.BlockSpec((1, H), lambda i: (0, 0)),
                pl.BlockSpec((H, A_pad), lambda i: (0, 0)),
                pl.BlockSpec((1, A_pad), lambda i: (0, 0)),
            ],
            out_specs=pl.BlockSpec((tb, A_pad), lambda i: (i, 0)),
        ),
        compiler_params=pltpu.CompilerParams(**cp_kwargs),
    )(x, w1c, b1c, w2c, b2c)

    if slice_output:
        return out[:B, :n_actions]
    # Padded rows/lanes are NOT zero (relu(b1)@w2 + b2); only the [:B, :A]
    # region is meaningful -- the consumer must slice before any reduction.
    return out


def dqn_forward(state, w1, b1, w2, b2, **kwargs):
    """Convenience wrapper (prepares params on every call; prefer the
    prepare_params + dqn_forward_prepared pair inside loops)."""
    params, n_actions = prepare_params(w1, b1, w2, b2)
    return dqn_forward_prepared(state, params, n_actions, **kwargs)


def _ref_forward(state, w1, b1, w2, b2, compute_dtype=jnp.bfloat16):
    # Pure-JAX reference with the same bf16-operand / f32-accumulate recipe.
    x = state.astype(compute_dtype)
    h = jnp.dot(x, w1.astype(compute_dtype),
                preferred_element_type=jnp.float32) + b1
    h = jnp.maximum(h, 0.0)
    a = jnp.dot(h.astype(compute_dtype), w2.astype(compute_dtype),
                preferred_element_type=jnp.float32) + b2
    return a


if __name__ == "__main__":
    # Bitflip-HER style sizes: input_dims = 2 * n_bits (state ++ goal), n_actions = n_bits.
    n_bits = 8
    batch = 8
    input_dims = 2 * n_bits   # 16
    hidden = 256
    n_actions = n_bits        # 8

    key = jax.random.PRNGKey(0)
    k_x, k_w1, k_b1, k_w2, k_b2, k_x2 = jax.random.split(key, 6)

    state = jax.random.normal(k_x, (batch, input_dims), dtype=jnp.float32)

    # Deterministic synthetic params (PyTorch-Linear shapes, stored transposed: [in, out]).
    bound1 = 1.0 / (input_dims ** 0.5)
    w1 = jax.random.uniform(k_w1, (input_dims, hidden), jnp.float32, -bound1, bound1)
    b1 = jax.random.uniform(k_b1, (hidden,), jnp.float32, -bound1, bound1)
    bound2 = 1.0 / (hidden ** 0.5)
    w2 = jax.random.uniform(k_w2, (hidden, n_actions), jnp.float32, -bound2, bound2)
    b2 = jax.random.uniform(k_b2, (n_actions,), jnp.float32, -bound2, bound2)

    # Prepare params ONCE; reuse for every forward call (main wrapper-side win).
    params, A = prepare_params(w1, b1, w2, b2)

    # --- single-tile path (B=8 -> tb=16, one grid step) ---
    actions = dqn_forward_prepared(state, params, A)
    jax.block_until_ready(actions)
    expected = _ref_forward(state, w1, b1, w2, b2)
    assert actions.shape == (batch, n_actions)
    assert jnp.allclose(actions, expected, atol=1e-3, rtol=1e-3), "mismatch vs reference"

    # Second call reuses the same prepared params + compiled executable.
    actions_again = dqn_forward_prepared(state, params, A)
    jax.block_until_ready(actions_again)
    assert jnp.allclose(actions_again, expected, atol=1e-3, rtol=1e-3)

    # --- multi-tile path (B=20, block_rows=8 -> tb=16, grid=(2,), batch padded to 32) ---
    batch2 = 20
    state2 = jax.random.normal(k_x2, (batch2, input_dims), dtype=jnp.float32)
    actions2 = dqn_forward_prepared(state2, params, A, block_rows=8)
    jax.block_until_ready(actions2)
    expected2 = _ref_forward(state2, w1, b1, w2, b2)
    assert actions2.shape == (batch2, n_actions)
    assert jnp.allclose(actions2, expected2, atol=1e-3, rtol=1e-3), "mismatch vs reference (tiled)"

    # --- convenience wrapper path (prepares params internally) ---
    actions3 = dqn_forward(state, w1, b1, w2, b2)
    jax.block_until_ready(actions3)
    assert jnp.allclose(actions3, expected, atol=1e-3, rtol=1e-3)

    print("KERNEL_OK")
</pallas_src>

<mosaic_0001>
module attributes {stable_mosaic.version = 11 : i64} {
  func.func @_dqn_kernel(%arg0: i32, %arg1: memref<16x16xf32, #tpu.memory_space<vmem>>, %arg2: memref<16x256xbf16, #tpu.memory_space<vmem>>, %arg3: memref<1x256xf32, #tpu.memory_space<vmem>>, %arg4: memref<256x128xbf16, #tpu.memory_space<vmem>>, %arg5: memref<1x128xf32, #tpu.memory_space<vmem>>, %arg6: memref<16x128xf32, #tpu.memory_space<vmem>>) attributes {dimension_semantics = [#tpu.dimension_semantics<parallel>], iteration_bounds = array<i64: 1>, scalar_prefetch = 0 : i64, scratch_operands = 0 : i64, tpu.core_type = #tpu.core_type<tc>, window_params = [{transform_indices = @transform_0, window_bounds = array<i64: 16, 16>}, {pipeline_mode = #tpu.pipeline_mode<synchronous>, transform_indices = @transform_1, window_bounds = array<i64: 16, 256>}, {pipeline_mode = #tpu.pipeline_mode<synchronous>, transform_indices = @transform_2, window_bounds = array<i64: 1, 256>}, {pipeline_mode = #tpu.pipeline_mode<synchronous>, transform_indices = @transform_3, window_bounds = array<i64: 256, 128>}, {pipeline_mode = #tpu.pipeline_mode<synchronous>, transform_indices = @transform_4, window_bounds = array<i64: 1, 128>}, {transform_indices = @transform_5, window_bounds = array<i64: 16, 128>}]} {
    %c0 = arith.constant 0 : index
    %c0_0 = arith.constant 0 : index
    %0 = vector.load %arg1[%c0, %c0_0] : memref<16x16xf32, #tpu.memory_space<vmem>>, vector<16x16xf32>
    %1 = arith.truncf %0 : vector<16x16xf32> to vector<16x16xbf16>
    %c0_1 = arith.constant 0 : index
    %c0_2 = arith.constant 0 : index
    %2 = vector.load %arg2[%c0_1, %c0_2] : memref<16x256xbf16, #tpu.memory_space<vmem>>, vector<16x256xbf16>
    %cst = arith.constant dense<0.000000e+00> : vector<16x256xf32>
    %3 = tpu.matmul %1, %2, %cst {dimension_numbers = #tpu.dot_dimension_numbers<[1], [0], [0], [1], [0, 0, 1, 1], [], []>} : vector<16x16xbf16>, vector<16x256xbf16>, vector<16x256xf32> -> vector<16x256xf32>
    %c0_3 = arith.constant 0 : index
    %c0_4 = arith.constant 0 : index
    %4 = vector.load %arg3[%c0_3, %c0_4] : memref<1x256xf32, #tpu.memory_space<vmem>>, vector<1x256xf32>
    %5 = vector.broadcast %4 : vector<1x256xf32> to vector<16x256xf32>
    %6 = arith.addf %3, %5 : vector<16x256xf32>
    %cst_5 = arith.constant 0.000000e+00 : f32
    %7 = vector.broadcast %cst_5 : f32 to vector<16x256xf32>
    %8 = arith.maximumf %6, %7 : vector<16x256xf32>
    %9 = arith.truncf %8 : vector<16x256xf32> to vector<16x256xbf16>
    %c0_6 = arith.constant 0 : index
    %c0_7 = arith.constant 0 : index
    %10 = vector.load %arg4[%c0_6, %c0_7] : memref<256x128xbf16, #tpu.memory_space<vmem>>, vector<256x128xbf16>
    %cst_8 = arith.constant dense<0.000000e+00> : vector<16x128xf32>
    %11 = tpu.matmul %9, %10, %cst_8 {dimension_numbers = #tpu.dot_dimension_numbers<[1], [0], [0], [1], [0, 0, 1, 1], [], []>} : vector<16x256xbf16>, vector<256x128xbf16>, vector<16x128xf32> -> vector<16x128xf32>
    %c0_9 = arith.constant 0 : index
    %c0_10 = arith.constant 0 : index
    %12 = vector.load %arg5[%c0_9, %c0_10] : memref<1x128xf32, #tpu.memory_space<vmem>>, vector<1x128xf32>
    %13 = vector.broadcast %12 : vector<1x128xf32> to vector<16x128xf32>
    %14 = arith.addf %11, %13 : vector<16x128xf32>
    %c0_11 = arith.constant 0 : index
    %c0_12 = arith.constant 0 : index
    %15 = vector.load %arg6[%c0_11, %c0_12] : memref<16x128xf32, #tpu.memory_space<vmem>>, vector<16x128xf32>
    tpu.vector_store %arg6[%c0_11, %c0_12], %14 {strides = array<i32>} : memref<16x128xf32, #tpu.memory_space<vmem>>, vector<16x128xf32>,
    return
  }
  func.func @transform_0(%arg0: i32) -> (i32, i32) {
    %c0_i32 = arith.constant 0 : i32
    %c0_i32_0 = arith.constant 0 : i32
    return %arg0, %c0_i32 : i32, i32
  }
  func.func @transform_1(%arg0: i32) -> (i32, i32) {
    %c0_i32 = arith.constant 0 : i32
    %c0_i32_0 = arith.constant 0 : i32
    %c0_i32_1 = arith.constant 0 : i32
    return %c0_i32, %c0_i32_0 : i32, i32
  }
  func.func @transform_2(%arg0: i32) -> (i32, i32) {
    %c0_i32 = arith.constant 0 : i32
    %c0_i32_0 = arith.constant 0 : i32
    %c0_i32_1 = arith.constant 0 : i32
    return %c0_i32, %c0_i32_0 : i32, i32
  }
  func.func @transform_3(%arg0: i32) -> (i32, i32) {
    %c0_i32 = arith.constant 0 : i32
    %c0_i32_0 = arith.constant 0 : i32
    %c0_i32_1 = arith.constant 0 : i32
    return %c0_i32, %c0_i32_0 : i32, i32
  }
  func.func @transform_4(%arg0: i32) -> (i32, i32) {
    %c0_i32 = arith.constant 0 : i32
    %c0_i32_0 = arith.constant 0 : i32
    %c0_i32_1 = arith.constant 0 : i32
    return %c0_i32, %c0_i32_0 : i32, i32
  }
  func.func @transform_5(%arg0: i32) -> (i32, i32) {
    %c0_i32 = arith.constant 0 : i32
    %c0_i32_0 = arith.constant 0 : i32
    return %arg0, %c0_i32 : i32, i32
  }
}

</mosaic_0001>

<bundles_post_ra>
// kernel: dqn_forward_prepared.1
= control target key start
LH: loop header
LB: loop body
LE: loop exit
PB: predicated region body
PF: predicated region fallthrough
CT: control target
= control target key end

     0   :  { %10 = vsyncpa [#allocation3], 0  ;;  %s385_s18 = smov [#allocation2]   ;;  %s446_s0 = inlined_call_operand.vmem [shape: f32[16,16], index: 0, kind: input, shape index: {}]   ;;  %s447_s1 = inlined_call_operand.vmem [shape: bf16[16,256], index: 1, kind: input, shape index: {}]   ;;  %s448_s2 = inlined_call_operand.vmem [shape: f32[1,256], index: 2, kind: input, shape index: {}]   ;;  %s449_s3 = inlined_call_operand.hbm [shape: bf16[256,128], index: 3, kind: input, shape index: {}]   ;;  %s450_s4 = inlined_call_operand.vmem [shape: f32[1,128], index: 4, kind: input, shape index: {}]   ;;  %s451_s5 = inlined_call_operand.vmem [shape: f32[16,128], index: 5, kind: output, shape index: {}]  }
   0x1   :  { %s22_s19 = sshll.u32 %s385_s18, 4  ;;  %s23_s19 = int_to_ptr.vmem [resolvable:$true] %s22_s19 }
   0x2   :  { %s371_s20 = scalar_lea.vmem %s23_s19, 2048  ;;  %p376_p1 = scmp.lt.s32.totalorder %s23_s19, %s23_s19 }
   0x3   :  { %p372_p0 = scmp.ne.s32.totalorder %s23_s19, %s371_s20  ;;  %p377_p2 = scmp.lt.s32.totalorder %s371_s20, %s371_s20 }
   0x5   :  { %p378_p3 = por %p377_p2, %p376_p1 }
   0x7   :  { %p379_p4 = pnand %p378_p3, %p372_p0 }
   0x9   :  { %382 = shalt.err (!%p379_p4)
}
   0xa   :  { %s386_s21 = smov 64   ;;  %s387_s22 = smov 4  }
   0xb   :  { %28 = dma.hbm_to_vmem [thread:$0]  %s449_s3, 2048, %s23_s19, [#allocation3], %s386_s21, %s386_s21, %s387_s22  }
   0xc   :  { %383 = dma.done.wait [#allocation3], 2048  }
   0xd   :  { %384 = vsyncadd [#allocation3], 4294965248  ;;  %v388_v0 = vmov 0   ;;  %v344_v1 = vld [vmem:[%s447_s1 + $0x4] ss:$8 sps:$4 sm:$0xff]   ;;  %v347_v6 = vld [vmem:[#allocation2 + $0x78] sm:$0xff]   ;;  %v42_v22 = vlaneseq }
   0xe   :  { %98 = vmatprep.mubr.bf16.mxu0 %v388_v0  ;;  %v346_v2 = vld [vmem:[%s447_s1] ss:$8 sps:$4 sm:$0xff]   ;;  %80 = vmatprep.subr.bf16.mxu0 %v344_v1  ;;  %vm62_vm0 = vcmask 130048   ;;  %v348_v7 = vld [vmem:[#allocation2 + $0x38] sm:$0xff]   ;;  %v349_v8 = vld [vmem:[#allocation2 + $0x70] sm:$0xff]  }
   0xf   :  { %v35_v3 = vld [vmem:[%s446_s0] sm:$0xff]  ;;  %v36_v4 = vld [vmem:[%s446_s0 + $0x8] sm:$0xff]  ;;  %81 = vmatpush1.bf16.msra.mxu0 %v346_v2  ;;  %318 = vmatprep.subr.bf16.mxu1 %v347_v6  ;;  %v350_v9 = vld [vmem:[#allocation2 + $0x30] sm:$0xff]   ;;  %v43_v23 = vshrl.u32 %v42_v22, 7 }
  0x10   :  { %v37_v5 = vpack.c.bf16 %v36_v4, %v35_v3  ;;  %319 = vmatpush3.bf16.msra.mxu1 %v348_v7  ;;  %v351_v10 = vld [vmem:[#allocation2 + $0x68] sm:$0xff]   ;;  %v353_v12 = vld [vmem:[#allocation2 + $0x60] sm:$0xff]   ;;  %v355_v14 = vld [vmem:[#allocation2 + $0x58] sm:$0xff]  }
  0x11   :  { %320 = vmatprep.subr.bf16.mxu1 %v349_v8  ;;  %v352_v11 = vld [vmem:[#allocation2 + $0x28] sm:$0xff]   ;;  %v354_v13 = vld [vmem:[#allocation2 + $0x20] sm:$0xff]   ;;  %v356_v15 = vld [vmem:[#allocation2 + $0x18] sm:$0xff]   ;;  %v48_v24 = vsub.s32 1, %v43_v23  ;;  %v44_v25 = vsub.s32 0, %v43_v23 }
  0x12   :  { %300 = vmatmul.mubr.msk.bf16.vlgmr.msra.gmra.mxu0 %vm62_vm0, %v37_v5  ;;  %v357_v16 = vld [vmem:[#allocation2 + $0x50] sm:$0xff]   ;;  %v359_v18 = vld [vmem:[#allocation2 + $0x48] sm:$0xff]   ;;  %v361_v20 = vld [vmem:[#allocation2 + $0x40] sm:$0xff]  }
  0x13   :  { %v358_v17 = vld [vmem:[#allocation2 + $0x10] sm:$0xff]   ;;  %v360_v19 = vld [vmem:[#allocation2 + $0x8] sm:$0xff]   ;;  %v362_v21 = vld [vmem:[#allocation2] sm:$0xff]  }
  0x14   :  { %321 = vmatpush3.bf16.msra.mxu1 %v350_v9  ;;  %v40_v26 = vld [vmem:[%s448_s2] sm:$0x3] }
  0x15   :  { %322 = vmatprep.subr.bf16.mxu1 %v351_v10  ;;  %v49_v28 = vrot.slane %v40_v26, %v48_v24  ;;  %v45_v29 = vrot.slane %v40_v26, %v44_v25  ;;  %v301_v44 = vld [vmem:[%s450_s4] ss:$0 sm:$0xff] }
  0x18   :  { %323 = vmatpush3.bf16.msra.mxu1 %v352_v11 }
  0x19   :  { %324 = vmatprep.subr.bf16.mxu1 %v353_v12 }
  0x1c   :  { %325 = vmatpush3.bf16.msra.mxu1 %v354_v13 }
  0x1d   :  { %326 = vmatprep.subr.bf16.mxu1 %v355_v14 }
  0x20   :  { %327 = vmatpush3.bf16.msra.mxu1 %v356_v15 }
  0x21   :  { %328 = vmatprep.subr.bf16.mxu1 %v357_v16 }
  0x24   :  { %329 = vmatpush3.bf16.msra.mxu1 %v358_v17 }
  0x25   :  { %330 = vmatprep.subr.bf16.mxu1 %v359_v18 }
  0x28   :  { %331 = vmatpush3.bf16.msra.mxu1 %v360_v19 }
  0x29   :  { %332 = vmatprep.subr.bf16.mxu1 %v361_v20 }
  0x2c   :  { %333 = vmatpush3.bf16.msra.mxu1 %v362_v21 }
  0xd2   :  { %v100_v27 = vpop.f32.mrf.mxu0 }
  0xd3   :  { %v101_v34 = vadd.f32 %v100_v27, %v45_v29 }
  0xd4   :  { %v102_v30 = vpop.f32.mrf.mxu0 }
  0xd5   :  { %v103_v32 = vadd.f32 %v102_v30, %v49_v28  ;;  %v109_v40 = vmax.f32 %v101_v34, 0.0 }
  0xd6   :  { %v104_v31 = vpop.f32.mrf.mxu0 }
  0xd7   :  { %v105_v33 = vadd.f32 %v104_v31, %v45_v29  ;;  %v110_v38 = vmax.f32 %v103_v32, 0.0 }
  0xd8   :  { %v106_v35 = vpop.f32.mrf.mxu0 }
  0xd9   :  { %v107_v36 = vadd.f32 %v106_v35, %v49_v28  ;;  %v111_v37 = vmax.f32 %v105_v33, 0.0 }
  0xdb   :  { %v112_v39 = vmax.f32 %v107_v36, 0.0  ;;  %v113_v42 = vpack.c.bf16 %v111_v37, %v109_v40 }
  0xdd   :  { %v114_v41 = vpack.c.bf16 %v112_v39, %v110_v38 }
  0xdf   :  { %282 = vmatprep.mubr.bf16.mxu1 %v114_v41 }
  0xe0   :  { %283 = vmatmul.mubr.bf16.vlgmr.msra.gmra.mxu1 %v113_v42 }
 0x1a0   :  { %v334_v43 = vpop.f32.mrf.mxu1 }
 0x1a2   :  { %v335_v45 = vpop.f32.mrf.mxu1 }
 0x1a3   :  { %v336_v46 = vadd.f32 %v335_v45, %v334_v43 }
 0x1a4   :  { %v337_v47 = vpop.f32.mrf.mxu1 }
 0x1a5   :  { %v285_v48 = vadd.f32 %v336_v46, %v301_v44 }
 0x1a6   :  { %v338_v49 = vpop.f32.mrf.mxu1 }
 0x1a7   :  { %291 = vst [vmem:[%s451_s5] sm:$0xff] %v285_v48  ;;  %v339_v50 = vadd.f32 %v338_v49, %v337_v47 }
 0x1a9   :  { %v288_v51 = vadd.f32 %v339_v50, %v301_v44 }
 0x1ab   :  { %292 = vst [vmem:[%s451_s5 + $0x8] sm:$0xff] %v288_v51 }
 0x1ac   :  { %297 = vsyncpa [#allocation3], 1 }

</bundles_post_ra>
